<compile_context>
chip_gen: v7x
topology: tpu7x:2x2x1
jax: 0.10.0
libtpu: 0.0.40
codegen_flags: <defaults>
</compile_context>

<pallas_src>
import math
from functools import partial

import jax
import jax.numpy as jnp
from jax.experimental import pallas as pl
from jax.experimental.pallas import tpu as pltpu


def _critic_kernel(xT_ref, w1T_ref, b1_ref, w2_ref, b2_ref, o_ref, *,
                   compute_dtype):
    # Cast the streamed f32 x tile to the MXU dtype in VMEM/vregs (cheap VPU
    # op hidden under the MXU; avoids a wrapper-side HBM cast pass).
    xT = xT_ref[...].astype(compute_dtype)                       # (D, tb)
    # Layer 1 on the MXU: (H, D) @ (D, tb) -> (H, tb), f32 accumulate.
    hT = jnp.dot(w1T_ref[...], xT, preferred_element_type=jnp.float32)
    hT = jnp.maximum(hT + b1_ref[...], 0.0)                      # bias col + ReLU
    # Layer 2 on the MXU: (1, H) @ (H, tb) -> (1, tb).  Lane-dense result,
    # no cross-lane XLU reduction, no masked column stores.
    v = jnp.dot(w2_ref[...], hT.astype(compute_dtype),
                preferred_element_type=jnp.float32)
    o_ref[...] = (v + b2_ref[0]).astype(o_ref.dtype)


def _round_up(n, m):
    return ((n + m - 1) // m) * m


def _pick_tile(B, block_b):
    """Batch tile: multiple of 128 (lane-dense), <= block_b, and >=2 grid
    steps when the batch is big enough (keeps both v7x TensorCores busy)."""
    block_b = max(128, (block_b // 128) * 128)
    tb = max(128, min(block_b, _round_up(B, 128)))
    if B > 2 * 128 and _round_up(B, tb) // tb < 2:
        tb = _round_up(pl.cdiv(B, 2), 128)
    return tb


def ppo_critic_forward(x, w1, b1, w2, b2, *, block_b=16384,
                       compute_dtype=jnp.bfloat16):
    """x: [B, D] f32 -> value: [B] f32 (matches PyTorch .squeeze(-1)).

    compute_dtype=jnp.bfloat16 by default (PPO value head); pass jnp.float32
    to match the f32 PyTorch reference bit-for-bit closer.
    """
    B, D = x.shape
    H = w1.shape[1]

    tb = _pick_tile(B, block_b)
    b_pad = _round_up(B, tb)
    nb = b_pad // tb

    # Single wrapper pass over x: transpose to feature-major (and pad along
    # the lane axis for ragged batches).  x stays f32; the bf16 cast happens
    # inside the kernel.
    xT = jnp.transpose(x)                                        # (D, B)
    if b_pad != B:
        xT = jnp.pad(xT, ((0, 0), (0, b_pad - B)))

    w1T_in = jnp.transpose(w1).astype(compute_dtype)             # (H, D) resident
    b1_in = b1.reshape(H, 1).astype(jnp.float32)                 # bias column
    w2_in = w2.reshape(1, H).astype(compute_dtype)               # row for layer-2 dot
    b2_in = b2.reshape(1).astype(jnp.float32)                    # scalar -> SMEM

    out = pl.pallas_call(
        partial(_critic_kernel, compute_dtype=compute_dtype),
        out_shape=jax.ShapeDtypeStruct((1, b_pad), jnp.float32),
        grid=(nb,),
        in_specs=[
            pl.BlockSpec((D, tb), lambda i: (0, i)),   # xT streamed, double-buffered
            pl.BlockSpec((H, D), lambda i: (0, 0)),    # W1T resident
            pl.BlockSpec((H, 1), lambda i: (0, 0)),    # b1 column resident
            pl.BlockSpec((1, H), lambda i: (0, 0)),    # w2 row resident
            pl.BlockSpec(memory_space=pltpu.MemorySpace.SMEM),   # b2 scalar
        ],
        out_specs=pl.BlockSpec((1, tb), lambda i: (0, i)),       # lane-dense store
        compiler_params=pltpu.CompilerParams(
            dimension_semantics=("parallel",),   # shards tiles across v7x's 2 TCs
        ),
    )(xT, w1T_in, b1_in, w2_in, b2_in)
    return out[0, :B]   # drop batch padding + squeeze(-1)


def _reference(x, w1, b1, w2, b2, compute_dtype=jnp.bfloat16):
    """Pure-JAX reference using the same bf16-input / f32-accumulate recipe."""
    h = jnp.dot(x.astype(compute_dtype), w1.astype(compute_dtype),
                preferred_element_type=jnp.float32)
    h = jnp.maximum(h + b1.reshape(1, -1), 0.0)
    v = jnp.dot(h.astype(compute_dtype), w2.reshape(-1, 1).astype(compute_dtype),
                preferred_element_type=jnp.float32) + b2.reshape(1, 1)
    return v[:, 0]


def critic_value(x, params, *, min_pallas_batch=512, block_b=16384):
    """Small batches: pallas_call launch + weight DMA dominates -> plain XLA."""
    w1, b1, w2, b2 = params
    if x.shape[0] < min_pallas_batch:
        return _reference(x, w1, b1, w2, b2)
    return ppo_critic_forward(x, w1, b1, w2, b2, block_b=block_b)


def init_params(key, input_dim, hidden=128):
    """torch.nn.Linear-style init: U[-1/sqrt(fan_in), 1/sqrt(fan_in)]."""
    k1, k2, k3, k4 = jax.random.split(key, 4)
    bound1 = 1.0 / math.sqrt(input_dim)
    bound2 = 1.0 / math.sqrt(hidden)
    w1 = jax.random.uniform(k1, (input_dim, hidden), jnp.float32, -bound1, bound1)
    b1 = jax.random.uniform(k2, (1, hidden), jnp.float32, -bound1, bound1)
    w2 = jax.random.uniform(k3, (hidden, 1), jnp.float32, -bound2, bound2)
    b2 = jax.random.uniform(k4, (1, 1), jnp.float32, -bound2, bound2)
    return w1, b1, w2, b2


if __name__ == "__main__":
    key = jax.random.PRNGKey(0)
    k_in, k_param = jax.random.split(key)

    input_dim = 8          # LunarLander-v3 observation dim
    batch = 512            # small batch; tile picker gives tb=256, grid of 2
    x = jax.random.normal(k_in, (batch, input_dim), dtype=jnp.float32)
    w1, b1, w2, b2 = init_params(k_param, input_dim)
    ref = _reference(x, w1, b1, w2, b2)

    # Main path: 2 grid steps of 256 rows, lane-dense (1, 256) output tiles.
    values = jax.block_until_ready(ppo_critic_forward(x, w1, b1, w2, b2))
    assert values.shape == (batch,)
    assert jnp.allclose(values, ref, atol=3e-3, rtol=3e-3), \
        float(jnp.max(jnp.abs(values - ref)))

    # Ragged batch (not a multiple of the tile) -> lane-axis padding path;
    # pads to the same (8, 512) shapes so the kernel compile is reused.
    vr = jax.block_until_ready(ppo_critic_forward(x[:300], w1, b1, w2, b2))
    assert vr.shape == (300,)
    assert jnp.allclose(vr, ref[:300], atol=3e-3, rtol=3e-3)

    # Tiny-batch dispatch falls back to plain XLA (fixed pallas cost dominates).
    vt = jax.block_until_ready(critic_value(x[:16], (w1, b1, w2, b2)))
    assert vt.shape == (16,)
    assert jnp.allclose(vt, ref[:16], atol=3e-3, rtol=3e-3)

    print("KERNEL_OK")
</pallas_src>

<mosaic_0001>
module attributes {stable_mosaic.version = 11 : i64} {
  func.func @_critic_kernel(%arg0: i32, %arg1: memref<8x256xf32, #tpu.memory_space<vmem>>, %arg2: memref<128x8xbf16, #tpu.memory_space<vmem>>, %arg3: memref<128x1xf32, #tpu.memory_space<vmem>>, %arg4: memref<1x128xbf16, #tpu.memory_space<vmem>>, %arg5: memref<1xf32, #tpu.memory_space<smem>>, %arg6: memref<1x256xf32, #tpu.memory_space<vmem>>) attributes {dimension_semantics = [#tpu.dimension_semantics<parallel>], iteration_bounds = array<i64: 2>, scalar_prefetch = 0 : i64, scratch_operands = 0 : i64, tpu.core_type = #tpu.core_type<tc>, window_params = [{transform_indices = @transform_0, window_bounds = array<i64: 8, 256>}, {pipeline_mode = #tpu.pipeline_mode<synchronous>, transform_indices = @transform_1, window_bounds = array<i64: 128, 8>}, {pipeline_mode = #tpu.pipeline_mode<synchronous>, transform_indices = @transform_2, window_bounds = array<i64: 128, 1>}, {pipeline_mode = #tpu.pipeline_mode<synchronous>, transform_indices = @transform_3, window_bounds = array<i64: 1, 128>}, {transform_indices = @transform_4, window_bounds = array<i64: 1>}, {transform_indices = @transform_5, window_bounds = array<i64: 1, 256>}]} {
    %c0 = arith.constant 0 : index
    %c0_0 = arith.constant 0 : index
    %0 = vector.load %arg1[%c0, %c0_0] : memref<8x256xf32, #tpu.memory_space<vmem>>, vector<8x256xf32>
    %1 = arith.truncf %0 : vector<8x256xf32> to vector<8x256xbf16>
    %c0_1 = arith.constant 0 : index
    %c0_2 = arith.constant 0 : index
    %2 = vector.load %arg2[%c0_1, %c0_2] : memref<128x8xbf16, #tpu.memory_space<vmem>>, vector<128x8xbf16>
    %cst = arith.constant dense<0.000000e+00> : vector<128x256xf32>
    %3 = tpu.matmul %2, %1, %cst {dimension_numbers = #tpu.dot_dimension_numbers<[1], [0], [0], [1], [0, 0, 1, 1], [], []>} : vector<128x8xbf16>, vector<8x256xbf16>, vector<128x256xf32> -> vector<128x256xf32>
    %c0_3 = arith.constant 0 : index
    %c0_4 = arith.constant 0 : index
    %4 = vector.load %arg3[%c0_3, %c0_4] : memref<128x1xf32, #tpu.memory_space<vmem>>, vector<128x1xf32>
    %5 = vector.broadcast %4 : vector<128x1xf32> to vector<128x256xf32>
    %6 = arith.addf %3, %5 : vector<128x256xf32>
    %cst_5 = arith.constant 0.000000e+00 : f32
    %7 = vector.broadcast %cst_5 : f32 to vector<128x256xf32>
    %8 = arith.maximumf %6, %7 : vector<128x256xf32>
    %c0_6 = arith.constant 0 : index
    %c0_7 = arith.constant 0 : index
    %9 = vector.load %arg4[%c0_6, %c0_7] : memref<1x128xbf16, #tpu.memory_space<vmem>>, vector<1x128xbf16>
    %10 = arith.truncf %8 : vector<128x256xf32> to vector<128x256xbf16>
    %cst_8 = arith.constant dense<0.000000e+00> : vector<1x256xf32>
    %11 = tpu.matmul %9, %10, %cst_8 {dimension_numbers = #tpu.dot_dimension_numbers<[1], [0], [0], [1], [0, 0, 1, 1], [], []>} : vector<1x128xbf16>, vector<128x256xbf16>, vector<1x256xf32> -> vector<1x256xf32>
    %c0_9 = arith.constant 0 : index
    %12 = memref.load %arg5[%c0_9] : memref<1xf32, #tpu.memory_space<smem>>
    %13 = vector.broadcast %12 : f32 to vector<1x256xf32>
    %14 = arith.addf %11, %13 : vector<1x256xf32>
    %c0_10 = arith.constant 0 : index
    %c0_11 = arith.constant 0 : index
    %15 = vector.load %arg6[%c0_10, %c0_11] : memref<1x256xf32, #tpu.memory_space<vmem>>, vector<1x256xf32>
    tpu.vector_store %arg6[%c0_10, %c0_11], %14 {strides = array<i32>} : memref<1x256xf32, #tpu.memory_space<vmem>>, vector<1x256xf32>,
    return
  }
  func.func @transform_0(%arg0: i32) -> (i32, i32) {
    %c0_i32 = arith.constant 0 : i32
    %c0_i32_0 = arith.constant 0 : i32
    return %c0_i32, %arg0 : i32, i32
  }
  func.func @transform_1(%arg0: i32) -> (i32, i32) {
    %c0_i32 = arith.constant 0 : i32
    %c0_i32_0 = arith.constant 0 : i32
    %c0_i32_1 = arith.constant 0 : i32
    return %c0_i32, %c0_i32_0 : i32, i32
  }
  func.func @transform_2(%arg0: i32) -> (i32, i32) {
    %c0_i32 = arith.constant 0 : i32
    %c0_i32_0 = arith.constant 0 : i32
    %c0_i32_1 = arith.constant 0 : i32
    return %c0_i32, %c0_i32_0 : i32, i32
  }
  func.func @transform_3(%arg0: i32) -> (i32, i32) {
    %c0_i32 = arith.constant 0 : i32
    %c0_i32_0 = arith.constant 0 : i32
    %c0_i32_1 = arith.constant 0 : i32
    return %c0_i32, %c0_i32_0 : i32, i32
  }
  func.func @transform_4(%arg0: i32) -> i32 {
    %c0_i32 = arith.constant 0 : i32
    %c0_i32_0 = arith.constant 0 : i32
    return %c0_i32 : i32
  }
  func.func @transform_5(%arg0: i32) -> (i32, i32) {
    %c0_i32 = arith.constant 0 : i32
    %c0_i32_0 = arith.constant 0 : i32
    return %c0_i32, %arg0 : i32, i32
  }
}

</mosaic_0001>

<bundles_post_ra>
// kernel: tpu_custom_call.1
= control target key start
LH: loop header
LB: loop body
LE: loop exit
PB: predicated region body
PF: predicated region fallthrough
CT: control target
= control target key end

     0   :  { %s1092_s0 = inlined_call_operand.vmem [shape: f32[8,512], index: 0, kind: input, shape index: {}]   ;;  %s1093_s1 = inlined_call_operand.vmem [shape: bf16[128,8], index: 1, kind: input, shape index: {}]   ;;  %s1094_s2 = inlined_call_operand.vmem [shape: f32[128,1], index: 2, kind: input, shape index: {}]   ;;  %s1095_s3 = inlined_call_operand.vmem [shape: bf16[1,128], index: 3, kind: input, shape index: {}]   ;;  %s1096_s4 = inlined_call_operand.<no memory space> [shape: f32[1], index: 4, kind: input, shape index: {}]   ;;  %s1097_s5 = inlined_call_operand.hbm [shape: f32[1,512], index: 5, kind: output, shape index: {}]  }
   0x1   :  { %10 = sst [smem:[#allocation2]] %s1096_s4 }
   0x2   :  { %11 = vsyncpa [#allocation4], 0 }
   0x3   :  { %13 = vsyncpa [#allocation4 + $0x1], 0  ;;  %s899_s20 = smov 0   ;;  %s901_s21 = smov 0  }
   0x4   :  { %s903_s22 = smov 0   ;;  %s905_s23 = smov 0  }
   0x5 LB: > { %s920_s4 = sadd.s32 4294967295, %s861_s23   ;;  %s718_s24 = sadd.s32 4294967294, %s861_s23   ;;  %s861_s23 = sphi %s905_s23, %s1103_s23   ;;  %s857_s22 = sphi %s903_s22, %s1102_s22   ;;  %s853_s21 = sphi %s901_s21, %s1101_s21   ;;  %s849_s20 = sphi %s899_s20, %s1100_s20  }
   0x6   : > { %s924_s25 = sadd.s32 1, %s861_s23   ;;  %s136_s26 = sadd.s32 1, %s857_s22 }
   0x7   : > { %s133_s27 = ssub.s32 %s861_s23, %s924_s25  ;;  %p146_p0 = scmp.ne.s32.totalorder %s857_s22, %s853_s21 }
   0x8   : > { %p134_p1 = scmp.eq.s32.totalorder %s133_s27, 0  ;;  %p147_p2 = scmp.eq.s32.totalorder %s920_s4, 1 }
   0x9   : > { %p152_p3 = scmp.ne.s32.totalorder %s853_s21, %s849_s20  ;;  %p153_p4 = scmp.eq.s32.totalorder %s718_s24, 1 }
   0xa   : > { %s935_s28 = scalar_select %p134_p1, %s857_s22, %s136_s26  }
   0xb   : > { %p937_p5 = por %p147_p2, %p146_p0  ;;  %p941_p6 = por %p153_p4, %p152_p3 }
   0xc   : > { %p721_p7 = scmp.ge.s32.totalorder %s861_s23, 1  ;;  %p192_p8 = scmp.lt.s32.totalorder %s861_s23, 3 }
   0xe   : > { %p193_p9 = pnand %p721_p7, %p192_p8 }
   0xf   : > { %s723_s6 = sshll.u32 (!%p193_p9), %s920_s4, 1  ;;  %v863_v0 = vmov (!%p193_p9), 0   ;;  %vm409_vm0 = vcmask (!%p193_p9), 1043456   ;;  %v248_v5 = vld [vmem:[%s1094_s2] sm:$0xff] (!%p193_p9)  ;;  %v250_v8 = vld [vmem:[%s1094_s2 + $0x10] sm:$0xff] (!%p193_p9)  ;;  %vm384_vm1 = vcmask (!%p193_p9), 64512  }
  0x10   : > { %196 = sbr.rel (%p193_p9) target bundleno = 549 (0x225), region = 40  ;;  %p221_p10 = scmp.lt.s32.totalorder (!%p193_p9), %s723_s6, 3  ;;  %448 = vmatprep.mubr.bf16.mxu0 (!%p193_p9), %v863_v0  ;;  %789 = vset.pattern.permute.xlu0 (!%p193_p9), %v863_v0  ;;  %v791_v7 = vld [vmem:[%s1093_s1] sm:$0xff] (!%p193_p9)   ;;  %v249_v9 = vld [vmem:[%s1094_s2 + $0x8] sm:$0xff] (!%p193_p9)  ;;  %v251_v10 = vld [vmem:[%s1094_s2 + $0x18] sm:$0xff] (!%p193_p9) }
  0x11   : > { %790 = vset.pattern.permute.xlu1 (!%p193_p9), %v863_v0  ;;  %612 = vmatprep.mubr.bf16.mxu1 (!%p193_p9), %v863_v0  ;;  %v252_v11 = vld [vmem:[%s1094_s2 + $0x20] sm:$0xff] (!%p193_p9)  ;;  %v253_v12 = vld [vmem:[%s1094_s2 + $0x28] sm:$0xff] (!%p193_p9)  ;;  %v254_v14 = vld [vmem:[%s1094_s2 + $0x30] sm:$0xff] (!%p193_p9)  ;;  %s217_s11 = sand.u32 (!%p193_p9), 1, %s853_s21   ;;  %s747_s13 = sshll.u32 (!%p193_p9), %s920_s4, 5 }
  0x12   : > { %266 = vperm.xlu0 (!%p193_p9), %789, %v248_v5   ;;  %276 = vperm.xlu1 (!%p193_p9), %790, %v250_v8   ;;  %v792_v13 = vld [vmem:[%s1093_s1 + $0x8] sm:$0xff] (!%p193_p9)   ;;  %v255_v15 = vld [vmem:[%s1094_s2 + $0x38] sm:$0xff] (!%p193_p9)  ;;  %v256_v16 = vld [vmem:[%s1094_s2 + $0x40] sm:$0xff] (!%p193_p9)  ;;  %s722_s12 = sshll.u32 (!%p193_p9), %s217_s11, 1  ;;  %s1050_s18 = scalar_lea.hbm (!%p193_p9), %s1097_s5, %s747_s13 }
  0x13   : > { %v257_v17 = vld [vmem:[%s1094_s2 + $0x48] sm:$0xff] (!%p193_p9)  ;;  %v793_v18 = vld [vmem:[%s1093_s1 + $0x10] sm:$0xff] (!%p193_p9)   ;;  %v259_v20 = vld [vmem:[%s1094_s2 + $0x58] sm:$0xff] (!%p193_p9)  ;;  %s219_s14 = scalar_lea.vmem (!%p193_p9), [#allocation3], %s722_s12  ;;  %s645_s19 = scalar_lea.sflag (!%p193_p9), [#allocation4], %s217_s11 }
  0x14   : > { %v258_v19 = vld [vmem:[%s1094_s2 + $0x50] sm:$0xff] (!%p193_p9)  ;;  %v260_v21 = vld [vmem:[%s1094_s2 + $0x60] sm:$0xff] (!%p193_p9)  ;;  %v261_v22 = vld [vmem:[%s1094_s2 + $0x68] sm:$0xff] (!%p193_p9)  ;;  %s659_s15 = sshll.u32 (!%p193_p9), %s219_s14, 4  ;;  %s865_s4 = smov (!%p193_p9), [#allocation3]   ;;  %s1052_s15 = int_to_ptr.vmem [resolvable:$true] %s659_s15 }
  0x15   : > { %v794_v23 = vld [vmem:[%s1093_s1 + $0x18] sm:$0xff] (!%p193_p9)   ;;  %v262_v24 = vld [vmem:[%s1094_s2 + $0x70] sm:$0xff] (!%p193_p9)  ;;  %v795_v26 = vld [vmem:[%s1093_s1 + $0x20] sm:$0xff] (!%p193_p9)   ;;  %s799_s24 = scalar_lea.vmem (!%p193_p9), %s1052_s15, 32  ;;  %s803_s26 = sshll.u32 (!%p193_p9), %s865_s4, 4  ;;  %s804_s26 = int_to_ptr.vmem [resolvable:$false] %s803_s26 }
  0x16   : > { %271 = vperm.xlu0 (!%p193_p9), %789, %v249_v9   ;;  %281 = vperm.xlu1 (!%p193_p9), %790, %v251_v10   ;;  %v263_v25 = vld [vmem:[%s1094_s2 + $0x78] sm:$0xff] (!%p193_p9)  ;;  %v796_v27 = vld [vmem:[%s1093_s1 + $0x28] sm:$0xff] (!%p193_p9)   ;;  %v797_v28 = vld [vmem:[%s1093_s1 + $0x30] sm:$0xff] (!%p193_p9)   ;;  %p800_p11 = scmp.ne.s32.totalorder (!%p193_p9), %s1052_s15, %s799_s24  ;;  %s805_s27 = scalar_lea.vmem (!%p193_p9), %s804_s26, 64 }
  0x17   : > { %s1105_s6 = smov (!%p221_p10, %s723_s6), 3  ;;  %v798_v29 = vld [vmem:[%s1093_s1 + $0x38] sm:$0xff]   ;;  %p806_p0 = scmp.lt.s32.totalorder %s1052_s15, %s804_s26 }
  0x18   : > { %s724_s7 = sshll.u32 %s1105_s6, 3  ;;  %p801_p12 = pnand %p800_p11, %p937_p5 }
  0x19   : > { %s224_s10 = scalar_lea.vmem %s1092_s0, %s724_s7  ;;  %p807_p1 = scmp.lt.s32.totalorder %s805_s27, %s799_s24 }
  0x1a   : > { %v229_v1 = vld [vmem:[%s224_s10 + $0x8] sm:$0xff]  ;;  %v228_v2 = vld [vmem:[%s224_s10] sm:$0xff]  ;;  %286 = vperm.xlu0 %789, %v252_v11   ;;  %291 = vperm.xlu1 %790, %v253_v12   ;;  %s578_s10 = sld [smem:[#allocation2]]  ;;  %p802_p13 = pneg %p801_p12 }
  0x1b   : > { %v231_v3 = vpack.c.bf16 %v229_v1, %v229_v1  ;;  %v230_v4 = vpack.c.bf16 %v228_v2, %v228_v2  ;;  %p808_p2 = por %p807_p1, %p806_p0 }
  0x1d   : > { %733 = vmatprep.subr.msk.bf16.mxu0 %vm409_vm0, %v231_v3  ;;  %v411_v6 = vsel %vm409_vm0, %v230_v4, 0  ;;  %p809_p3 = pnand %p808_p2, %p802_p13 }
  0x1e   : > { %417 = vmatpush1.bf16.msra.mxu0 %v411_v6  ;;  %296 = vperm.xlu0 %789, %v254_v14  }
  0x1f   : > { %301 = vperm.xlu1 %790, %v255_v15  }
  0x21   : > { %734 = vmatmul.mubr.msk.bf16.vlgmr.msra.gmra.mrb[0].mxu0 %vm384_vm1, %v791_v7 }
  0x22   : > { %458 = vmatprep.mubr.bf16.mxu0 %v863_v0  ;;  %306 = vperm.xlu0 %789, %v256_v16  }
  0x23   : > { %311 = vperm.xlu1 %790, %v257_v17  }
  0x26   : > { %316 = vperm.xlu0 %789, %v258_v19  }
  0x27   : > { %321 = vperm.xlu1 %790, %v259_v20  }
  0x29   : > { %735 = vmatmul.mubr.msk.bf16.gmra.mrb[4].mxu0 %vm384_vm1, %v792_v13 }
  0x2a   : > { %468 = vmatprep.mubr.bf16.mxu0 %v863_v0  ;;  %326 = vperm.xlu0 %789, %v260_v21  }
  0x2b   : > { %331 = vperm.xlu1 %790, %v261_v22  }
  0x2e   : > { %336 = vperm.xlu0 %789, %v262_v24  }
  0x2f   : > { %341 = vperm.xlu1 %790, %v263_v25  }
  0x31   : > { %736 = vmatmul.mubr.msk.bf16.gmra.mrb[8].mxu0 %vm384_vm1, %v793_v18 }
  0x32   : > { %478 = vmatprep.mubr.bf16.mxu0 %v863_v0 }
  0x39   : > { %737 = vmatmul.mubr.msk.bf16.gmra.mrb[12].mxu0 %vm384_vm1, %v794_v23 }
  0x3a   : > { %488 = vmatprep.mubr.bf16.mxu0 %v863_v0 }
  0x41   : > { %738 = vmatmul.mubr.msk.bf16.gmra.mrb[16].mxu0 %vm384_vm1, %v795_v26 }
  0x42   : > { %498 = vmatprep.mubr.bf16.mxu0 %v863_v0 }
  0x49   : > { %739 = vmatmul.mubr.msk.bf16.gmra.mrb[20].mxu0 %vm384_vm1, %v796_v27 }
  0x4a   : > { %508 = vmatprep.mubr.bf16.mxu0 %v863_v0 }
  0x51   : > { %740 = vmatmul.mubr.msk.bf16.gmra.mrb[24].mxu0 %vm384_vm1, %v797_v28 }
  0x52   : > { %518 = vmatprep.mubr.bf16.mxu0 %v863_v0 }
  0x59   : > { %741 = vmatmul.mubr.msk.bf16.gmra.mrb[28].mxu0 %vm384_vm1, %v798_v29 }
  0x91   : > { %v267_v30 = vpop.permute.xlu0 %266  ;;  %v277_v39 = vpop.permute.xlu1 %276 }
  0x95   : > { %v272_v32 = vpop.permute.xlu0 %271  ;;  %v282_v50 = vpop.permute.xlu1 %281 }
  0x99   : > { %v287_v61 = vpop.permute.xlu0 %286  ;;  %v292_v2 = vpop.permute.xlu1 %291 }
  0x9d   : > { %v297_v13 = vpop.permute.xlu0 %296 }
  0x9e   : > { %v302_v18 = vpop.permute.xlu1 %301 }
  0xa1   : > { %v307_v29 = vpop.permute.xlu0 %306 }
  0xf4   : > { %v450_v31 = vpop.f32.mrb[0].mxu0 }
  0xf5   : > { %v451_v33 = vadd.f32 %v450_v31, %v267_v30  ;;  %v452_v34 = vpop.f32.mrb[1].mxu0 }
  0xf6   : > { %v453_v35 = vadd.f32 %v452_v34, %v267_v30  ;;  %v454_v36 = vpop.f32.mrb[2].mxu0  ;;  %v312_v34 = vpop.permute.xlu1 %311 }
  0xf7   : > { %v455_v37 = vadd.f32 %v454_v36, %v272_v32  ;;  %v456_v38 = vpop.f32.mrb[3].mxu0  ;;  %v529_v41 = vmax.f32 %v451_v33, 0.0 }
  0xf8   : > { %v457_v40 = vadd.f32 %v456_v38, %v272_v32  ;;  %v530_v43 = vmax.f32 %v453_v35, 0.0 }
  0xf9   : > { %v531_v42 = vmax.f32 %v455_v37, 0.0 }
  0xfa   : > { %v532_v44 = vmax.f32 %v457_v40, 0.0 }
  0xfb   : > { %v562_v45 = vpack.c.bf16 %v531_v42, %v529_v41 }
  0xfc   : > { %v460_v46 = vpop.f32.mrb[4].mxu0  ;;  %v563_v47 = vpack.c.bf16 %v532_v44, %v530_v43 }
  0xfd   : > { %v461_v48 = vadd.f32 %v460_v46, %v277_v39  ;;  %v462_v49 = vpop.f32.mrb[5].mxu0 }
  0xfe   : > { %v463_v51 = vadd.f32 %v462_v49, %v277_v39  ;;  %v464_v52 = vpop.f32.mrb[6].mxu0  ;;  %580 = vmatprep.subr.bf16.mxu1 %v563_v47 }
  0xff   : > { %v465_v53 = vadd.f32 %v464_v52, %v282_v50  ;;  %v466_v54 = vpop.f32.mrb[7].mxu0  ;;  %581 = vmatpush1.bf16.msra.mxu1 %v562_v45  ;;  %v533_v56 = vmax.f32 %v461_v48, 0.0  ;;  %v317_v45 = vpop.permute.xlu0 %316 }
 0x100   : > { %v467_v55 = vadd.f32 %v466_v54, %v282_v50  ;;  %v534_v58 = vmax.f32 %v463_v51, 0.0  ;;  %v322_v50 = vpop.permute.xlu1 %321 }
 0x101   : > { %v535_v57 = vmax.f32 %v465_v53, 0.0 }
 0x102   : > { %v536_v59 = vmax.f32 %v467_v55, 0.0 }
 0x103   : > { %v564_v60 = vpack.c.bf16 %v535_v57, %v533_v56 }
 0x104   : > { %v565_v62 = vpack.c.bf16 %v536_v59, %v534_v58  ;;  %v470_v63 = vpop.f32.mrb[8].mxu0 }
 0x105   : > { %v471_v0 = vadd.f32 %v470_v63, %v287_v61  ;;  %v472_v1 = vpop.f32.mrb[9].mxu0 }
 0x106   : > { %v473_v3 = vadd.f32 %v472_v1, %v287_v61  ;;  %v474_v4 = vpop.f32.mrb[10].mxu0  ;;  %582 = vmatprep.subr.bf16.mxu1 %v565_v62  ;;  %v327_v61 = vpop.permute.xlu0 %326 }
 0x107   : > { %v475_v5 = vadd.f32 %v474_v4, %v292_v2  ;;  %v476_v6 = vpop.f32.mrb[11].mxu0  ;;  %583 = vmatpush1.bf16.msra.mxu1 %v564_v60  ;;  %v537_v8 = vmax.f32 %v471_v0, 0.0 }
 0x108   : > { %v477_v7 = vadd.f32 %v476_v6, %v292_v2  ;;  %v538_v10 = vmax.f32 %v473_v3, 0.0  ;;  %v332_v2 = vpop.permute.xlu1 %331 }
 0x109   : > { %v539_v9 = vmax.f32 %v475_v5, 0.0 }
 0x10a   : > { %v540_v11 = vmax.f32 %v477_v7, 0.0 }
 0x10b   : > { %v566_v12 = vpack.c.bf16 %v539_v9, %v537_v8 }
 0x10c   : > { %v567_v14 = vpack.c.bf16 %v540_v11, %v538_v10  ;;  %v480_v15 = vpop.f32.mrb[12].mxu0 }
 0x10d   : > { %v481_v16 = vadd.f32 %v480_v15, %v297_v13  ;;  %v482_v17 = vpop.f32.mrb[13].mxu0 }
 0x10e   : > { %v483_v19 = vadd.f32 %v482_v17, %v297_v13  ;;  %v484_v20 = vpop.f32.mrb[14].mxu0  ;;  %584 = vmatprep.subr.bf16.mxu1 %v567_v14  ;;  %v337_v13 = vpop.permute.xlu0 %336 }
 0x10f   : > { %v485_v21 = vadd.f32 %v484_v20, %v302_v18  ;;  %v486_v22 = vpop.f32.mrb[15].mxu0  ;;  %585 = vmatpush1.bf16.msra.mxu1 %v566_v12  ;;  %v541_v24 = vmax.f32 %v481_v16, 0.0 }
 0x110   : > { %v487_v23 = vadd.f32 %v486_v22, %v302_v18  ;;  %v542_v26 = vmax.f32 %v483_v19, 0.0  ;;  %v342_v18 = vpop.permute.xlu1 %341 }
 0x111   : > { %v543_v25 = vmax.f32 %v485_v21, 0.0 }
 0x112   : > { %v544_v27 = vmax.f32 %v487_v23, 0.0 }
 0x113   : > { %v568_v28 = vpack.c.bf16 %v543_v25, %v541_v24 }
 0x114   : > { %v569_v30 = vpack.c.bf16 %v544_v27, %v542_v26  ;;  %v490_v31 = vpop.f32.mrb[16].mxu0 }
 0x115   : > { %v491_v32 = vadd.f32 %v490_v31, %v307_v29  ;;  %v492_v33 = vpop.f32.mrb[17].mxu0  ;;  %v864_v31 = vmov 1966171168  }
 0x116   : > { %v493_v35 = vadd.f32 %v492_v33, %v307_v29  ;;  %v494_v36 = vpop.f32.mrb[18].mxu0  ;;  %586 = vmatprep.subr.bf16.mxu1 %v569_v30  ;;  %v561_v30 = vld [vmem:[%s1095_s3] sm:$0x1]  ;;  %v627_v33 = vlaneseq }
 0x117   : > { %v495_v37 = vadd.f32 %v494_v36, %v312_v34  ;;  %v496_v38 = vpop.f32.mrb[19].mxu0  ;;  %587 = vmatpush1.bf16.msra.mxu1 %v568_v28  ;;  %v545_v40 = vmax.f32 %v491_v32, 0.0  ;;  %v625_v32 = vunpack.c.l.s4 %v864_v31 }
 0x118   : > { %v497_v39 = vadd.f32 %v496_v38, %v312_v34  ;;  %v546_v42 = vmax.f32 %v493_v35, 0.0  ;;  %v579_v34 = vstv %s578_s10  ;;  %v628_v36 = vshrl.u32 %v627_v33, 7 }
 0x119   : > { %v547_v41 = vmax.f32 %v495_v37, 0.0  ;;  %v626_v35 = vunpack.c.0.s8 %v625_v32  ;;  %vm641_vm2 = vcmp.lt.s32.totalorder %v627_v33, 256 }
 0x11a   : > { %v548_v43 = vmax.f32 %v497_v39, 0.0 }
 0x11b   : > { %v570_v44 = vpack.c.bf16 %v547_v41, %v545_v40  ;;  %v629_v41 = vsub.s32 %v626_v35, %v628_v36 }
 0x11c   : > { %v571_v46 = vpack.c.bf16 %v548_v43, %v546_v42  ;;  %v500_v47 = vpop.f32.mrb[20].mxu0 }
 0x11d   : > { %v501_v48 = vadd.f32 %v500_v47, %v317_v45  ;;  %v502_v49 = vpop.f32.mrb[21].mxu0 }
 0x11e   : > { %v503_v51 = vadd.f32 %v502_v49, %v317_v45  ;;  %v504_v52 = vpop.f32.mrb[22].mxu0  ;;  %588 = vmatprep.subr.bf16.mxu1 %v571_v46 }
 0x11f   : > { %v505_v53 = vadd.f32 %v504_v52, %v322_v50  ;;  %v506_v54 = vpop.f32.mrb[23].mxu0  ;;  %589 = vmatpush1.bf16.msra.mxu1 %v570_v44  ;;  %v549_v56 = vmax.f32 %v501_v48, 0.0 }
 0x120   : > { %v507_v55 = vadd.f32 %v506_v54, %v322_v50  ;;  %v550_v58 = vmax.f32 %v503_v51, 0.0 }
 0x121   : > { %v551_v57 = vmax.f32 %v505_v53, 0.0 }
 0x122   : > { %v552_v59 = vmax.f32 %v507_v55, 0.0 }
 0x123   : > { %v572_v60 = vpack.c.bf16 %v551_v57, %v549_v56 }
 0x124   : > { %v573_v62 = vpack.c.bf16 %v552_v59, %v550_v58  ;;  %v510_v63 = vpop.f32.mrb[24].mxu0 }
 0x125   : > { %v511_v0 = vadd.f32 %v510_v63, %v327_v61  ;;  %v512_v1 = vpop.f32.mrb[25].mxu0 }
 0x126   : > { %v513_v3 = vadd.f32 %v512_v1, %v327_v61  ;;  %v514_v4 = vpop.f32.mrb[26].mxu0  ;;  %590 = vmatprep.subr.bf16.mxu1 %v573_v62 }
 0x127   : > { %v515_v5 = vadd.f32 %v514_v4, %v332_v2  ;;  %v516_v6 = vpop.f32.mrb[27].mxu0  ;;  %591 = vmatpush1.bf16.msra.mxu1 %v572_v60  ;;  %v553_v8 = vmax.f32 %v511_v0, 0.0 }
 0x128   : > { %v517_v7 = vadd.f32 %v516_v6, %v332_v2  ;;  %v554_v10 = vmax.f32 %v513_v3, 0.0 }
 0x129   : > { %v555_v9 = vmax.f32 %v515_v5, 0.0 }
 0x12a   : > { %v556_v11 = vmax.f32 %v517_v7, 0.0 }
 0x12b   : > { %v574_v12 = vpack.c.bf16 %v555_v9, %v553_v8 }
 0x12c   : > { %v575_v14 = vpack.c.bf16 %v556_v11, %v554_v10  ;;  %v520_v15 = vpop.f32.mrb[28].mxu0 }
 0x12d   : > { %v521_v16 = vadd.f32 %v520_v15, %v337_v13  ;;  %v522_v17 = vpop.f32.mrb[29].mxu0 }
 0x12e   : > { %v523_v19 = vadd.f32 %v522_v17, %v337_v13  ;;  %v524_v20 = vpop.f32.mrb[30].mxu0  ;;  %592 = vmatprep.subr.bf16.mxu1 %v575_v14 }
 0x12f   : > { %v525_v21 = vadd.f32 %v524_v20, %v342_v18  ;;  %v526_v22 = vpop.f32.mrb[31].mxu0  ;;  %593 = vmatpush1.bf16.msra.mxu1 %v574_v12  ;;  %v557_v24 = vmax.f32 %v521_v16, 0.0 }
 0x130   : > { %v527_v23 = vadd.f32 %v526_v22, %v342_v18  ;;  %v558_v26 = vmax.f32 %v523_v19, 0.0 }
 0x131   : > { %v559_v25 = vmax.f32 %v525_v21, 0.0 }
 0x132   : > { %v560_v27 = vmax.f32 %v527_v23, 0.0 }
 0x133   : > { %v576_v28 = vpack.c.bf16 %v559_v25, %v557_v24 }
 0x134   : > { %v577_v29 = vpack.c.bf16 %v560_v27, %v558_v26 }
 0x136   : > { %594 = vmatprep.subr.bf16.mxu1 %v577_v29 }
 0x137   : > { %595 = vmatpush1.bf16.msra.mxu1 %v576_v28 }
 0x13a   : > { %613 = vmatmul.mubr.bf16.vlgmr.msra.gmra.mrb[0].mxu1 %v561_v30 }
 0x20d   : > { %v614_v37 = vpop.f32.mrb[0].mxu1 }
 0x20e   : > { %v615_v38 = vadd.f32 %v614_v37, %v579_v34  ;;  %v616_v39 = vpop.f32.mrb[1].mxu1 }
 0x20f   : > { %v617_v40 = vadd.f32 %v616_v39, %v579_v34  ;;  %v618_v42 = vpop.f32.mrb[2].mxu1 }
 0x210   : > { %v619_v43 = vpop.f32.mrb[3].mxu1 }
 0x211   : > { %v623_v44 = vcombine.low %v615_v38, %v617_v40 }
 0x213   : > { %v630_v45 = vrot.slane %v623_v44, %v629_v41 }
 0x215   : > { %v637_v46 = vrot.slane %v630_v45, %v629_v41 }
 0x217   : > { %643 = vst.msk [vmem:[%s219_s14] sm:$0x3] %vm641_vm2, %v637_v46 }
 0x218   : > { %812 = shalt.err (!%p809_p3)
}
 0x219   : > { %s813_s6 = scalar_lea.hbm %s1050_s18, 32  ;;  %s817_s9 = scalar_lea.hbm %s1097_s5, 64 }
 0x21a   : > { %p814_p4 = scmp.ne.s32.totalorder %s1050_s18, %s813_s6  ;;  %p818_p9 = scmp.lt.u32.totalorder %s1050_s18, %s1097_s5 }
 0x21b   : > { %p819_p10 = scmp.lt.u32.totalorder %s817_s9, %s813_s6  ;;  %p821_p12 = scmp.lt.u32.totalorder %s813_s6, %s1050_s18 }
 0x21c   : > { %p815_p7 = pnand %p814_p4, %p937_p5 }
 0x21d   : > { %p820_p11 = por %p819_p10, %p818_p9 }
 0x21e   : > { %p816_p8 = pneg %p815_p7 }
 0x21f   : > { %p822_p13 = por %p821_p12, %p820_p11 }
 0x221   : > { %p823_p0 = pnand %p822_p13, %p816_p8 }
 0x223   : > { %826 = shalt.err (!%p823_p0)
}
 0x224   : > { %748 = dma.vmem_to_hbm [thread:$0]  (%p937_p5), %s1052_s15, 32, %s1050_s18, %s645_s19  }
 0x225 PF: > { %p754_p1 = scmp.ge.s32.totalorder %s861_s23, 2  ;;  %s671_s12 = sand.u32 1, %s849_s20  }
 0x226   : > { %s672_s13 = scalar_lea.sflag [#allocation4], %s671_s12 }
 0x227   : > { %p751_p2 = pnand %p754_p1, %p941_p6 }
 0x229   : > { %844 = dma.done.wait (!%p751_p2), %s672_s13, 32  }
 0x22a   : > { %846 = vsyncadd (!%p751_p2), %s672_s13, 4294967264  ;;  %p16_p3 = scmp.ge.s32.totalorder %s924_s25, 4   ;;  %s1100_s20 = smov %s853_s21 }
 0x22b   : > { %s1101_s21 = smov %s857_s22  ;;  %s1102_s22 = smov %s935_s28 }
 0x22c   : > { %s1103_s23 = smov %s924_s25  ;;  %18 = sbr.rel (!%p16_p3) target bundleno = 5 (0x5), region = 75 }
 0x233   :  { %677 = vsyncpa [#allocation4], 1 }
 0x234   :  { %679 = vsyncpa [#allocation4 + $0x1], 1 }

</bundles_post_ra>
